<compile_context>
chip_gen: v7x
topology: tpu7x:2x2x1
jax: 0.10.0
libtpu: 0.0.40
codegen_flags: <defaults>
</compile_context>

<pallas_src>
import functools
import math

import jax
import jax.numpy as jnp
from jax.experimental import pallas as pl
from jax.experimental.pallas import tpu as pltpu

MAX_ROW_TILE = 2048  # (2048, D) f32 block pads to <=1 MiB in VMEM -> safe everywhere


def _my_loss_kernel(pred_ref, tgt_ref, out_ref, sad_acc, col_acc, reg_acc,
                    *, sqrt_atom_num):
    b = pl.program_id(0)          # batch index
    j = pl.program_id(1)          # row-tile index within the batch
    nb = pl.num_programs(0)
    nj = pl.num_programs(1)

    p = pred_ref[...].astype(jnp.float32)   # (row_tile, D)
    t = tgt_ref[...].astype(jnp.float32)

    # ---- init global accumulators on the very first grid step ----
    @pl.when(jnp.logical_and(b == 0, j == 0))
    def _():
        sad_acc[...] = jnp.zeros_like(sad_acc)
        reg_acc[0] = 0.0

    # ---- reset per-batch net-force accumulator at the start of each batch ----
    @pl.when(j == 0)
    def _():
        col_acc[...] = jnp.zeros_like(col_acc)

    # ---- hot loop: vector-shaped VMEM accumulation only (VPU slots) ----
    sad_acc[...] += jnp.abs(p - t)      # partial sums of |pred - target|
    col_acc[...] += p                   # partial per-feature net force

    # ---- end of this batch: add its net-force L2 norm ----
    @pl.when(j == nj - 1)
    def _():
        s = jnp.sum(col_acc[...], axis=0, keepdims=True)           # (1, D)
        nrm = jnp.sqrt(jnp.sum(s * s, axis=-1, keepdims=True))     # (1, 1)
        reg_acc[0] += jnp.sum(nrm)

    # ---- final grid step: combine the L1 term and the regularization term ----
    @pl.when(jnp.logical_and(b == nb - 1, j == nj - 1))
    def _():
        out_ref[0] = jnp.sum(sad_acc[...]) + sqrt_atom_num * reg_acc[0]


def my_loss(pred, target, atom_num, batch_size):
    """Pallas TPU implementation of my_loss.forward(pred, target, atom_num, batch_size)."""
    assert pred.shape == target.shape
    n_rows = pred.shape[0]
    assert n_rows == atom_num * batch_size, (n_rows, atom_num, batch_size)

    # Zero-copy flatten of trailing feature dims: both the L1 sum and the
    # Frobenius norm of the per-batch atom-sum are invariant to this reshape.
    d = 1
    for s in pred.shape[1:]:
        d *= int(s)
    p2 = pred.reshape(n_rows, d)
    t2 = target.reshape(n_rows, d)

    # TODO(synk): support atom_num % 8 != 0 via an in-kernel row tail mask.
    assert atom_num % 8 == 0, "atom_num must be a multiple of 8 for this kernel"

    # Largest multiple-of-8 divisor of atom_num, capped at MAX_ROW_TILE.
    row_tile = 8
    r = 8
    while r <= min(atom_num, MAX_ROW_TILE):
        if atom_num % r == 0:
            row_tile = r
        r += 8
    inner = atom_num // row_tile
    grid = (batch_size, inner)

    kernel = functools.partial(_my_loss_kernel,
                               sqrt_atom_num=math.sqrt(atom_num))

    n_elems = n_rows * d
    out = pl.pallas_call(
        kernel,
        out_shape=jax.ShapeDtypeStruct((1,), jnp.float32),
        grid_spec=pltpu.PrefetchScalarGridSpec(
            num_scalar_prefetch=0,
            grid=grid,
            in_specs=[
                pl.BlockSpec((row_tile, d), lambda b, j: (b * inner + j, 0)),
                pl.BlockSpec((row_tile, d), lambda b, j: (b * inner + j, 0)),
            ],
            out_specs=pl.BlockSpec((1,), lambda b, j: (0,),
                                   memory_space=pltpu.SMEM),
            scratch_shapes=[
                pltpu.VMEM((row_tile, d), jnp.float32),   # |pred - target| acc
                pltpu.VMEM((row_tile, d), jnp.float32),   # per-batch pred acc
                pltpu.SMEM((1,), jnp.float32),            # sum of batch norms
            ],
        ),
        compiler_params=pltpu.CompilerParams(
            dimension_semantics=("arbitrary", "arbitrary")),
        cost_estimate=pl.CostEstimate(
            flops=5 * n_elems,
            transcendentals=batch_size,
            bytes_accessed=(p2.size + t2.size) * p2.dtype.itemsize + 4),
    )(p2, t2)
    return out[0]


def my_loss_ref(pred, target, atom_num, batch_size):
    """Pure-JAX reference matching the PyTorch module."""
    pred = pred.astype(jnp.float32)
    target = target.astype(jnp.float32)
    l1 = jnp.sum(jnp.abs(pred - target))
    pr = pred.reshape(batch_size, atom_num, -1)
    col = jnp.sum(pr, axis=1)                                   # (B, D)
    reg = jnp.sum(jnp.sqrt(jnp.sum(col * col, axis=-1)))
    return l1 + reg * jnp.float32(math.sqrt(atom_num))


if __name__ == "__main__":
    key = jax.random.PRNGKey(0)
    k1, k2 = jax.random.split(key)
    batch_size = 2
    atom_num = 32
    dim = 3
    shape = (batch_size * atom_num, dim)   # (atoms_total, 3) force-like tensors
    pred = jax.random.normal(k1, shape, dtype=jnp.float32)
    target = jax.random.normal(k2, shape, dtype=jnp.float32)

    out = my_loss(pred, target, atom_num, batch_size)
    out = jax.block_until_ready(out)

    ref = my_loss_ref(pred, target, atom_num, batch_size)
    assert jnp.allclose(out, ref, rtol=1e-5, atol=1e-4), (out, ref)

    print("KERNEL_OK")
</pallas_src>

<mosaic_0001>
module attributes {stable_mosaic.version = 11 : i64} {
  func.func @_my_loss_kernel(%arg0: i32, %arg1: i32, %arg2: memref<32x3xf32, #tpu.memory_space<vmem>>, %arg3: memref<32x3xf32, #tpu.memory_space<vmem>>, %arg4: memref<1xf32, #tpu.memory_space<smem>>, %arg5: memref<32x3xf32, #tpu.memory_space<vmem>>, %arg6: memref<32x3xf32, #tpu.memory_space<vmem>>, %arg7: memref<1xf32, #tpu.memory_space<smem>>) attributes {dimension_semantics = [#tpu.dimension_semantics<arbitrary>, #tpu.dimension_semantics<arbitrary>], iteration_bounds = array<i64: 2, 1>, scalar_prefetch = 0 : i64, scratch_operands = 3 : i64, tpu.core_type = #tpu.core_type<tc>, window_params = [{transform_indices = @transform_0, window_bounds = array<i64: 32, 3>}, {transform_indices = @transform_1, window_bounds = array<i64: 32, 3>}, {transform_indices = @transform_2, window_bounds = array<i64: 1>}]} {
    %c0 = arith.constant 0 : index
    %c0_0 = arith.constant 0 : index
    %0 = vector.load %arg2[%c0, %c0_0] : memref<32x3xf32, #tpu.memory_space<vmem>>, vector<32x3xf32>
    %c0_1 = arith.constant 0 : index
    %c0_2 = arith.constant 0 : index
    %1 = vector.load %arg3[%c0_1, %c0_2] : memref<32x3xf32, #tpu.memory_space<vmem>>, vector<32x3xf32>
    %c0_i32 = arith.constant 0 : i32
    %2 = arith.cmpi eq, %arg0, %c0_i32 : i32
    %c0_i32_3 = arith.constant 0 : i32
    %3 = arith.cmpi eq, %arg1, %c0_i32_3 : i32
    %4 = arith.andi %2, %3 : i1
    %5 = arith.extui %4 : i1 to i32
    %c0_i32_4 = arith.constant 0 : i32
    %6 = arith.cmpi ne, %5, %c0_i32_4 : i32
    scf.if %6 {
      %cst = arith.constant 0.000000e+00 : f32
      %26 = vector.broadcast %cst : f32 to vector<32x3xf32>
      %c0_19 = arith.constant 0 : index
      %c0_20 = arith.constant 0 : index
      %27 = vector.load %arg5[%c0_19, %c0_20] : memref<32x3xf32, #tpu.memory_space<vmem>>, vector<32x3xf32>
      tpu.vector_store %arg5[%c0_19, %c0_20], %26 {strides = array<i32>} : memref<32x3xf32, #tpu.memory_space<vmem>>, vector<32x3xf32>,
      %cst_21 = arith.constant 0.000000e+00 : f32
      %c0_22 = arith.constant 0 : index
      %28 = memref.load %arg7[%c0_22] : memref<1xf32, #tpu.memory_space<smem>>
      memref.store %cst_21, %arg7[%c0_22] : memref<1xf32, #tpu.memory_space<smem>>
    } else {
    }
    %c0_i32_5 = arith.constant 0 : i32
    %7 = arith.cmpi eq, %arg1, %c0_i32_5 : i32
    %8 = arith.extui %7 : i1 to i32
    %c0_i32_6 = arith.constant 0 : i32
    %9 = arith.cmpi ne, %8, %c0_i32_6 : i32
    scf.if %9 {
      %cst = arith.constant 0.000000e+00 : f32
      %26 = vector.broadcast %cst : f32 to vector<32x3xf32>
      %c0_19 = arith.constant 0 : index
      %c0_20 = arith.constant 0 : index
      %27 = vector.load %arg6[%c0_19, %c0_20] : memref<32x3xf32, #tpu.memory_space<vmem>>, vector<32x3xf32>
      tpu.vector_store %arg6[%c0_19, %c0_20], %26 {strides = array<i32>} : memref<32x3xf32, #tpu.memory_space<vmem>>, vector<32x3xf32>,
    } else {
    }
    %c0_7 = arith.constant 0 : index
    %c0_8 = arith.constant 0 : index
    %10 = vector.load %arg5[%c0_7, %c0_8] : memref<32x3xf32, #tpu.memory_space<vmem>>, vector<32x3xf32>
    %11 = arith.subf %0, %1 : vector<32x3xf32>
    %12 = math.absf %11 : vector<32x3xf32>
    %13 = arith.addf %10, %12 : vector<32x3xf32>
    %c0_9 = arith.constant 0 : index
    %c0_10 = arith.constant 0 : index
    %14 = vector.load %arg5[%c0_9, %c0_10] : memref<32x3xf32, #tpu.memory_space<vmem>>, vector<32x3xf32>
    tpu.vector_store %arg5[%c0_9, %c0_10], %13 {strides = array<i32>} : memref<32x3xf32, #tpu.memory_space<vmem>>, vector<32x3xf32>,
    %c0_11 = arith.constant 0 : index
    %c0_12 = arith.constant 0 : index
    %15 = vector.load %arg6[%c0_11, %c0_12] : memref<32x3xf32, #tpu.memory_space<vmem>>, vector<32x3xf32>
    %16 = arith.addf %15, %0 : vector<32x3xf32>
    %c0_13 = arith.constant 0 : index
    %c0_14 = arith.constant 0 : index
    %17 = vector.load %arg6[%c0_13, %c0_14] : memref<32x3xf32, #tpu.memory_space<vmem>>, vector<32x3xf32>
    tpu.vector_store %arg6[%c0_13, %c0_14], %16 {strides = array<i32>} : memref<32x3xf32, #tpu.memory_space<vmem>>, vector<32x3xf32>,
    %c0_i32_15 = arith.constant 0 : i32
    %18 = arith.cmpi eq, %arg1, %c0_i32_15 : i32
    %19 = arith.extui %18 : i1 to i32
    %c0_i32_16 = arith.constant 0 : i32
    %20 = arith.cmpi ne, %19, %c0_i32_16 : i32
    scf.if %20 {
      %c0_19 = arith.constant 0 : index
      %c0_20 = arith.constant 0 : index
      %26 = vector.load %arg6[%c0_19, %c0_20] : memref<32x3xf32, #tpu.memory_space<vmem>>, vector<32x3xf32>
      %cst = arith.constant dense<0.000000e+00> : vector<3xf32>
      %27 = vector.multi_reduction <add>, %26, %cst [0] : vector<32x3xf32> to vector<3xf32>
      %28 = vector.shape_cast %27 : vector<3xf32> to vector<1x3xf32>
      %29 = arith.mulf %28, %28 : vector<1x3xf32>
      %cst_21 = arith.constant dense<0.000000e+00> : vector<1xf32>
      %30 = vector.multi_reduction <add>, %29, %cst_21 [1] : vector<1x3xf32> to vector<1xf32>
      %31 = vector.shape_cast %30 : vector<1xf32> to vector<1x1xf32>
      %32 = math.sqrt %31 : vector<1x1xf32>
      %c0_22 = arith.constant 0 : index
      %33 = memref.load %arg7[%c0_22] : memref<1xf32, #tpu.memory_space<smem>>
      %34 = vector.shape_cast %32 : vector<1x1xf32> to vector<1x1x1xf32>
      %cst_23 = arith.constant dense<0.000000e+00> : vector<1xf32>
      %35 = vector.multi_reduction <add>, %34, %cst_23 [1, 2] : vector<1x1x1xf32> to vector<1xf32>
      %36 = vector.shape_cast %35 : vector<1xf32> to vector<1x1x1xf32>
      %37 = vector.extract %36[0, 0, 0] : f32 from vector<1x1x1xf32>
      %38 = arith.addf %33, %37 : f32
      %c0_24 = arith.constant 0 : index
      %39 = memref.load %arg7[%c0_24] : memref<1xf32, #tpu.memory_space<smem>>
      memref.store %38, %arg7[%c0_24] : memref<1xf32, #tpu.memory_space<smem>>
    } else {
    }
    %c1_i32 = arith.constant 1 : i32
    %21 = arith.cmpi eq, %arg0, %c1_i32 : i32
    %c0_i32_17 = arith.constant 0 : i32
    %22 = arith.cmpi eq, %arg1, %c0_i32_17 : i32
    %23 = arith.andi %21, %22 : i1
    %24 = arith.extui %23 : i1 to i32
    %c0_i32_18 = arith.constant 0 : i32
    %25 = arith.cmpi ne, %24, %c0_i32_18 : i32
    scf.if %25 {
      %c0_19 = arith.constant 0 : index
      %c0_20 = arith.constant 0 : index
      %26 = vector.load %arg5[%c0_19, %c0_20] : memref<32x3xf32, #tpu.memory_space<vmem>>, vector<32x3xf32>
      %27 = vector.shape_cast %26 : vector<32x3xf32> to vector<1x32x3xf32>
      %cst = arith.constant dense<0.000000e+00> : vector<1xf32>
      %28 = vector.multi_reduction <add>, %27, %cst [1, 2] : vector<1x32x3xf32> to vector<1xf32>
      %29 = vector.shape_cast %28 : vector<1xf32> to vector<1x1x1xf32>
      %30 = vector.extract %29[0, 0, 0] : f32 from vector<1x1x1xf32>
      %c0_21 = arith.constant 0 : index
      %31 = memref.load %arg7[%c0_21] : memref<1xf32, #tpu.memory_space<smem>>
      %cst_22 = arith.constant 5.65685415 : f32
      %32 = arith.mulf %cst_22, %31 : f32
      %33 = arith.addf %30, %32 : f32
      %c0_23 = arith.constant 0 : index
      %34 = memref.load %arg4[%c0_23] : memref<1xf32, #tpu.memory_space<smem>>
      memref.store %33, %arg4[%c0_23] : memref<1xf32, #tpu.memory_space<smem>>
    } else {
    }
    return
  }
  func.func @transform_0(%arg0: i32, %arg1: i32) -> (i32, i32) {
    %c1_i32 = arith.constant 1 : i32
    %0 = arith.muli %arg0, %c1_i32 : i32
    %1 = arith.addi %0, %arg1 : i32
    %c0_i32 = arith.constant 0 : i32
    %c0_i32_0 = arith.constant 0 : i32
    return %1, %c0_i32 : i32, i32
  }
  func.func @transform_1(%arg0: i32, %arg1: i32) -> (i32, i32) {
    %c1_i32 = arith.constant 1 : i32
    %0 = arith.muli %arg0, %c1_i32 : i32
    %1 = arith.addi %0, %arg1 : i32
    %c0_i32 = arith.constant 0 : i32
    %c0_i32_0 = arith.constant 0 : i32
    return %1, %c0_i32 : i32, i32
  }
  func.func @transform_2(%arg0: i32, %arg1: i32) -> i32 {
    %c0_i32 = arith.constant 0 : i32
    %c0_i32_0 = arith.constant 0 : i32
    return %c0_i32 : i32
  }
}

</mosaic_0001>

<bundles_post_ra>
// kernel: tpu_custom_call.1
= control target key start
LH: loop header
LB: loop body
LE: loop exit
PB: predicated region body
PF: predicated region fallthrough
CT: control target
= control target key end

     0   :  { %7 = vsyncpa [#allocation6], 0  ;;  %s490_s9 = smov 0   ;;  %s492_s10 = smov 0   ;;  %s568_s0 = inlined_call_operand.vmem [shape: f32[64,3], index: 0, kind: input, shape index: {}]   ;;  %s569_s1 = inlined_call_operand.vmem [shape: f32[64,3], index: 1, kind: input, shape index: {}]   ;;  %s570_s2 = inlined_call_operand.hbm [shape: f32[1], index: 2, kind: output, shape index: {}]  }
   0x1   :  { %s494_s11 = smov 0  }
   0x2 LB: > { %s375_s12 = sadd.s32 4294967295, %s469_s11   ;;  %s25_s13 = sadd.s32 1, %s465_s10  ;;  %s469_s11 = sphi %s494_s11, %s13_s11   ;;  %s465_s10 = sphi %s492_s10, %s572_s10   ;;  %s461_s9 = sphi %s490_s9, %s571_s9  }
   0x3   : > { %p27_p0 = scmp.ge.s32.totalorder %s25_s13, 2  ;;  %p378_p1 = scmp.ge.s32.totalorder %s469_s11, 1 }
   0x4   : > { %p140_p2 = scmp.lt.s32.totalorder %s469_s11, 3 }
   0x5   : > { %s574_s13 = smov (%p27_p0, %s25_s13), 0 }
   0x6   : > { %p141_p3 = pnand %p378_p1, %p140_p2 }
   0x7   : > { %s379_s14 = sshll.u32 (!%p141_p3), %s461_s9, 2  ;;  %p188_p4 = scmp.eq.s32.totalorder (!%p141_p3), %s461_s9, 0 }
   0x8   : > { %144 = sbr.rel (%p141_p3) target bundleno = 299 (0x12b), region = 28  ;;  %p166_p5 = scmp.lt.s32.totalorder (!%p141_p3), %s379_s14, 7 }
   0xf   : > { %s576_s14 = smov (!%p166_p5, %s379_s14), 7  ;;  %193 = sbr.rel (!%p188_p4) target bundleno = 22 (0x16), region = 32 }
  0x10   : > { %s380_s15 = sshll.u32 %s576_s14, 3  ;;  %vm194_vm0 = vcmask (%p188_p4), 23552   ;;  %v471_v8 = vmov (%p188_p4), 0.0   ;;  %s472_s22 = smov (%p188_p4), 0.0  }
  0x11   : > { %s169_s18 = scalar_lea.vmem %s568_s0, %s380_s15  ;;  %s177_s21 = scalar_lea.vmem %s569_s1, %s380_s15  ;;  %195 = vst.msk [vmem:[#allocation2] sm:$0xff] (%p188_p4), %vm194_vm0, %v471_v8  ;;  %196 = vst.msk [vmem:[#allocation2 + $0x8] sm:$0xff] (%p188_p4), %vm194_vm0, %v471_v8 }
  0x12   : > { %v180_v0 = vld [vmem:[%s169_s18] sm:$0xff]  ;;  %v181_v1 = vld [vmem:[%s169_s18 + $0x8] sm:$0xff]  ;;  %v182_v2 = vld [vmem:[%s169_s18 + $0x10] sm:$0xff]  ;;  %197 = vst.msk [vmem:[#allocation2 + $0x10] sm:$0xff] (%p188_p4), %vm194_vm0, %v471_v8  ;;  %200 = sst [smem:[#allocation4]] (%p188_p4), %s472_s22 }
  0x13   : > { %v183_v3 = vld [vmem:[%s169_s18 + $0x18] sm:$0xff]  ;;  %v184_v4 = vld [vmem:[%s177_s21] sm:$0xff]  ;;  %v185_v5 = vld [vmem:[%s177_s21 + $0x8] sm:$0xff]  ;;  %198 = vst.msk [vmem:[#allocation2 + $0x18] sm:$0xff] (%p188_p4), %vm194_vm0, %v471_v8 }
  0x14   : > { %v186_v6 = vld [vmem:[%s177_s21 + $0x10] sm:$0xff]  ;;  %v187_v7 = vld [vmem:[%s177_s21 + $0x18] sm:$0xff] }
  0x16 PF: > { %vm204_vm1 = vcmask 23552   ;;  %v213_v9 = vsub.f32 %v180_v0, %v184_v4  ;;  %v214_v10 = vsub.f32 %v181_v1, %v185_v5  ;;  %v473_v11 = vmov 0.0   ;;  %p279_p6 = scmp.eq.s32.totalorder %s461_s9, 1  ;;  %s273_s23 = sld [smem:[#allocation4]] }
  0x17   : > { %205 = vst.msk [vmem:[#allocation3] sm:$0xff] %vm204_vm1, %v473_v11  ;;  %206 = vst.msk [vmem:[#allocation3 + $0x8] sm:$0xff] %vm204_vm1, %v473_v11  ;;  %v215_v14 = vsub.f32 %v182_v2, %v186_v6  ;;  %v216_v15 = vsub.f32 %v183_v3, %v187_v7 }
  0x18   : > { %207 = vst.msk [vmem:[#allocation3 + $0x10] sm:$0xff] %vm204_vm1, %v473_v11  ;;  %208 = vst.msk [vmem:[#allocation3 + $0x18] sm:$0xff] %vm204_vm1, %v473_v11  ;;  %v209_v12 = vld [vmem:[#allocation2] sm:$0xff]  ;;  %v210_v13 = vld [vmem:[#allocation2 + $0x8] sm:$0xff]  ;;  %v217_v18 = vand.u32 2147483647, %v213_v9 }
  0x19   : > { %v211_v16 = vld [vmem:[#allocation2 + $0x10] sm:$0xff]  ;;  %v218_v19 = vand.u32 2147483647, %v214_v10  ;;  %v219_v20 = vand.u32 2147483647, %v215_v14 }
  0x1a   : > { %v212_v17 = vld [vmem:[#allocation2 + $0x18] sm:$0xff]  ;;  %v220_v21 = vand.u32 2147483647, %v216_v15  ;;  %v221_v22 = vadd.f32 %v217_v18, %v209_v12 }
  0x1b   : > { %v222_v23 = vadd.f32 %v218_v19, %v210_v13  ;;  %v223_v24 = vadd.f32 %v219_v20, %v211_v16 }
  0x1c   : > { %v224_v25 = vadd.f32 %v220_v21, %v212_v17  ;;  %226 = vst.msk [vmem:[#allocation2] sm:$0xff] %vm204_vm1, %v221_v22 }
  0x1d   : > { %227 = vst.msk [vmem:[#allocation2 + $0x8] sm:$0xff] %vm204_vm1, %v222_v23  ;;  %228 = vst.msk [vmem:[#allocation2 + $0x10] sm:$0xff] %vm204_vm1, %v223_v24 }
  0x1e   : > { %229 = vst.msk [vmem:[#allocation2 + $0x18] sm:$0xff] %vm204_vm1, %v224_v25  ;;  %v230_v26 = vld [vmem:[#allocation3] sm:$0xff]  ;;  %v231_v27 = vld [vmem:[#allocation3 + $0x8] sm:$0xff] }
  0x1f   : > { %v232_v28 = vld [vmem:[#allocation3 + $0x10] sm:$0xff]  ;;  %v233_v29 = vld [vmem:[#allocation3 + $0x18] sm:$0xff]  ;;  %v234_v30 = vadd.f32 %v230_v26, %v180_v0  ;;  %v235_v31 = vadd.f32 %v231_v27, %v181_v1 }
  0x20   : > { %v236_v32 = vadd.f32 %v232_v28, %v182_v2  ;;  %v237_v33 = vadd.f32 %v233_v29, %v183_v3 }
  0x21   : > { %238 = vst.msk [vmem:[#allocation3] sm:$0xff] %vm204_vm1, %v234_v30  ;;  %239 = vst.msk [vmem:[#allocation3 + $0x8] sm:$0xff] %vm204_vm1, %v235_v31 }
  0x22   : > { %240 = vst.msk [vmem:[#allocation3 + $0x10] sm:$0xff] %vm204_vm1, %v236_v32  ;;  %241 = vst.msk [vmem:[#allocation3 + $0x18] sm:$0xff] %vm204_vm1, %v237_v33 }
  0x23   : > { %v284_v59 = vld [vmem:[#allocation2] sm:$0xff] (%p279_p6) }
  0x24   : > { %v285_v60 = vld [vmem:[#allocation2 + $0x8] sm:$0xff] (%p279_p6)  ;;  %v286_v61 = vld [vmem:[#allocation2 + $0x10] sm:$0xff] (%p279_p6)  ;;  %v288_v63 = vsel (%p279_p6), %vm204_vm1, %v284_v59, 0.0 }
  0x25   : > { %v287_v62 = vld [vmem:[#allocation2 + $0x18] sm:$0xff] (%p279_p6)  ;;  %v289_v0 = vsel (%p279_p6), %vm204_vm1, %v285_v60, 0.0  ;;  %v291_v1 = vsel (%p279_p6), %vm204_vm1, %v286_v61, 0.0 }
  0x26   : > { %v290_v2 = vadd.f32 (%p279_p6), %v289_v0, %v288_v63  ;;  %v293_v3 = vsel (%p279_p6), %vm204_vm1, %v287_v62, 0.0 }
  0x28   : > { %v245_v34 = vld [vmem:[#allocation3] sm:$0xff]  ;;  %v246_v35 = vld [vmem:[#allocation3 + $0x8] sm:$0xff]  ;;  %v292_v4 = vadd.f32 (%p279_p6), %v291_v1, %v290_v2 }
  0x29   : > { %v247_v36 = vld [vmem:[#allocation3 + $0x10] sm:$0xff]  ;;  %v248_v37 = vld [vmem:[#allocation3 + $0x18] sm:$0xff]  ;;  %v249_v38 = vsel %vm204_vm1, %v245_v34, 0.0  ;;  %v250_v39 = vsel %vm204_vm1, %v246_v35, 0.0 }
  0x2a   : > { %v252_v40 = vsel %vm204_vm1, %v247_v36, 0.0  ;;  %v251_v41 = vadd.f32 %v250_v39, %v249_v38  ;;  %v254_v42 = vsel %vm204_vm1, %v248_v37, 0.0  ;;  %v294_v5 = vadd.f32 (%p279_p6), %v293_v3, %v292_v4 }
  0x2c   : > { %v253_v43 = vadd.f32 %v252_v40, %v251_v41 }
  0x2e   : > { %v255_v44 = vadd.f32 %v254_v42, %v253_v43 }
  0x30   : > { %v256_v45 = vrot.slane %v255_v44, 4 }
  0x32   : > { %v257_v46 = vadd.f32 %v256_v45, %v255_v44 }
  0x34   : > { %v258_v47 = vrot.slane %v257_v46, 2 }
  0x36   : > { %v259_v48 = vadd.f32 %v258_v47, %v257_v46 }
  0x38   : > { %v260_v49 = vrot.slane %v259_v48, 1 }
  0x3a   : > { %v261_v50 = vadd.f32 %v260_v49, %v259_v48 }
  0x3c   : > { %v262_v51 = vmul.f32 %v261_v50, %v261_v50 }
  0x3e   : > { %v263_v52 = vsel %vm204_vm1, %v262_v51, 0.0 }
  0x3f   : > { %264 = vadd.xlane.f32.xlu0 %v263_v52 }
  0x43   : > { %295 = vadd.xlane.f32.xlu0 (%p279_p6), %v294_v5 }
  0xcc   : > { %v265_v53 = vpop.xlane.xlu0 %264 }
  0xcd   : > { %429 = vrsqrt.f32 %v265_v53  ;;  %vm268_vm2 = vcmp.eq.f32.partialorder %v265_v53, inf  ;;  %v271_v56 = vand.u32 2147483648, %v265_v53  ;;  %vm270_vm3 = vcmp.eq.f32.partialorder %v265_v53, 0.0 }
  0xd0   : > { %v296_v6 = vpop.xlane.xlu0 (%p279_p6), %295 }
  0xd1   : > { %v297_v7 = vrot.slane (%p279_p6), %v296_v6, 4 }
  0xd3   : > { %v298_v8 = vadd.f32 (%p279_p6), %v297_v7, %v296_v6 }
  0xd5   : > { %v299_v9 = vrot.slane (%p279_p6), %v298_v8, 2 }
  0xd7   : > { %v430_v54 = vpop.eup %429  ;;  %v300_v10 = vadd.f32 (%p279_p6), %v299_v9, %v298_v8 }
  0xd8   : > { %v267_v55 = vmul.f32 %v430_v54, %v265_v53 }
  0xd9   : > { %v301_v11 = vrot.slane (%p279_p6), %v300_v10, 1 }
  0xda   : > { %v269_v57 = vsel %vm268_vm2, %v265_v53, %v267_v55 }
  0xdb   : > { %v272_v58 = vsel %vm270_vm3, %v271_v56, %v269_v57  ;;  %v302_v12 = vadd.f32 (%p279_p6), %v301_v11, %v300_v10 }
  0xdc   : > { %391 = vpush %v272_v58 }
  0xdd   : > { %393 = vpush (%p279_p6), %v302_v12 }
 0x10a   : > { %283 = sbr.rel (!%p279_p6) target bundleno = 284 (0x11c), region = 44 }
 0x10d   : > { %s392_s24 = spop %391 }
 0x10e   : > { %s276_s25 = sadd.f32 %s392_s24, %s273_s23  ;;  %s394_s28 = spop (%p279_p6), %393 }
 0x110   : > { %278 = sst [smem:[#allocation4]] %s276_s25 }
 0x111   : > { %s304_s26 = sld [smem:[#allocation4]] }
 0x117   : > { %s305_s27 = smul.f32 5.656854, %s304_s26 }
 0x119   : > { %s306_s29 = sadd.f32 %s394_s28, %s305_s27 }
 0x11b   : > { %308 = sst [smem:[#allocation5]] %s306_s29 }
 0x11c PF: > { %p399_p7 = scmp.eq.s32.totalorder %s375_s12, 1  ;;  %s431_s4 = scalar_lea.hbm %s570_s2, 16 }
 0x11d   : > { %p432_p8 = scmp.ne.s32.totalorder %s570_s2, %s431_s4  ;;  %p437_p11 = scmp.lt.u32.totalorder %s431_s4, %s570_s2 }
 0x11f   : > { %p433_p9 = pnand %p432_p8, %p399_p7 }
 0x121   : > { %p434_p10 = pneg %p433_p9 }
 0x123   : > { %p439_p12 = pnand %p437_p11, %p434_p10 }
 0x125   : > { %442 = shalt.err (!%p439_p12)
}
 0x126   : > { %s474_s9 = smov [#allocation5]  }
 0x127   : > { %396 = dma.smem_to_hbm (%p399_p7), %s474_s9, 16, %s570_s2, [#allocation6]  }
 0x128   : > { %456 = dma.done.wait (%p399_p7), [#allocation6], 16  }
 0x129   : > { %458 = vsyncadd (%p399_p7), [#allocation6], 4294967280 }
 0x12a   : > { %322 = sfence }
 0x12b PF: > { %s13_s11 = sadd.s32 1, %s469_s11   ;;  %s571_s9 = smov %s465_s10 }
 0x12c   : > { %p10_p13 = scmp.ge.s32.totalorder %s13_s11, 4   ;;  %s572_s10 = smov %s574_s13 }
 0x12e   :  { %12 = sbr.rel (!%p10_p13) target bundleno = 2 (0x2), region = 77 }
 0x135   :  { %328 = vsyncpa [#allocation6], 1 }
 0x136   :  { %330 = vsyncpa [#allocation6 + $0x1], 1 }

</bundles_post_ra>
